<compile_context>
chip_gen: v5e
topology: v5e:2x2
jax: 0.10.0
libtpu: 0.0.40
codegen_flags: <defaults>
</compile_context>

<pallas_src>
import functools
import math

import jax
import jax.numpy as jnp
from jax.experimental import pallas as pl
from jax.experimental.pallas import tpu as pltpu

DROPOUT_P = 0.1


def make_positional_encoding(max_len: int, d_model: int) -> jnp.ndarray:
    """Deterministic pe buffer, same math as the PyTorch __init__."""
    position = jnp.arange(0, max_len, dtype=jnp.float32)[:, None]            # (L, 1)
    div_term = jnp.exp(jnp.arange(0, d_model, 2, dtype=jnp.float32)
                       * (-math.log(10000.0) / d_model))                     # (D/2,)
    angles = position * div_term                                             # (L, D/2)
    pe = jnp.zeros((max_len, d_model), dtype=jnp.float32)
    pe = pe.at[:, 0::2].set(jnp.sin(angles))
    pe = pe.at[:, 1::2].set(jnp.cos(angles))
    return pe


def _pe_dropout_kernel(seed_ref, x_ref, pe_ref, o_ref, *,
                       dropout_p: float, tile_s: int, d_model: int):
    # x_ref / pe_ref / o_ref: (tile_s, d_model) VMEM tiles.
    # seed_ref: scalar-prefetch SMEM ref, shape (1,) int32.
    y = x_ref[...] + pe_ref[...]

    if dropout_p > 0.0:
        keep_prob = 1.0 - dropout_p
        # Global element index for every entry of this tile.
        row = jax.lax.broadcasted_iota(jnp.int32, (tile_s, d_model), 0)
        col = jax.lax.broadcasted_iota(jnp.int32, (tile_s, d_model), 1)
        flat = (pl.program_id(0) * tile_s + row) * d_model + col
        # murmur3 fmix32 of (flat index, seed): stateless and tiling-invariant,
        # so grid steps are fully independent (-> "parallel" semantics is safe).
        h = flat.astype(jnp.uint32) + seed_ref[0].astype(jnp.uint32) * jnp.uint32(0x9E3779B9)
        h = h ^ (h >> 16)
        h = h * jnp.uint32(0x85EBCA6B)
        h = h ^ (h >> 13)
        h = h * jnp.uint32(0xC2B2AE35)
        h = h ^ (h >> 16)
        # Integer keep-test on the top 24 random bits (signed-safe compare),
        # single select + survivor scale (inverted dropout).
        r24 = (h >> 8).astype(jnp.int32)
        threshold = jnp.int32(int(round(keep_prob * float(1 << 24))))
        y = jnp.where(r24 < threshold,
                      y * jnp.float32(1.0 / keep_prob),
                      jnp.float32(0.0))

    o_ref[...] = y.astype(o_ref.dtype)


def positional_encoding_forward(x, pe, seed, *, dropout_p=DROPOUT_P, tile_s=512):
    """x: (seq_len, d_model) f32; pe: (max_len, d_model) f32; seed: (1,) int32."""
    S, D = x.shape
    max_len, D_pe = pe.shape
    assert D == D_pe and S <= max_len

    # Largest useful row tile: multiple of 8, never (much) bigger than S.
    tile_s = max(8, min(int(tile_s), pl.cdiv(S, 8) * 8))
    grid = (pl.cdiv(S, tile_s),)   # partial last block is padded/masked by Pallas

    kernel = functools.partial(_pe_dropout_kernel, dropout_p=float(dropout_p),
                               tile_s=tile_s, d_model=D)
    return pl.pallas_call(
        kernel,
        out_shape=jax.ShapeDtypeStruct((S, D), x.dtype),
        grid_spec=pltpu.PrefetchScalarGridSpec(
            num_scalar_prefetch=1,
            grid=grid,
            in_specs=[
                pl.BlockSpec((tile_s, D), lambda i, seed: (i, 0)),  # x tile
                # Full pe buffer passed; the same block index selects the
                # matching rows directly (no wrapper-side pe[:S] copy).
                pl.BlockSpec((tile_s, D), lambda i, seed: (i, 0)),  # pe tile
            ],
            out_specs=pl.BlockSpec((tile_s, D), lambda i, seed: (i, 0)),
        ),
        compiler_params=pltpu.CompilerParams(
            dimension_semantics=("parallel",)),
    )(seed, x, pe)


if __name__ == "__main__":
    key = jax.random.PRNGKey(0)
    # Small demo shapes; last dim kept a multiple of 128 so stores stay
    # lane-dense (the real module's d_model=512 also satisfies this).
    seq_len, d_model, max_len = 48, 128, 256

    x = jax.random.normal(key, (seq_len, d_model), dtype=jnp.float32)
    pe = make_positional_encoding(max_len, d_model)
    seed = jnp.array([0], dtype=jnp.int32)

    # Correctness with dropout disabled: kernel must equal x + pe[:S].
    y_nodrop = jax.block_until_ready(
        positional_encoding_forward(x, pe, seed, dropout_p=0.0))
    ref = x + pe[:seq_len, :]
    assert jnp.allclose(y_nodrop, ref, atol=1e-6, rtol=1e-6), "add path mismatch"

    # Training-mode dropout: every element is either 0 or ref / keep_prob.
    y = jax.block_until_ready(
        positional_encoding_forward(x, pe, seed, dropout_p=DROPOUT_P))
    assert y.shape == (seq_len, d_model) and y.dtype == jnp.float32
    keep_prob = 1.0 - DROPOUT_P
    scaled = ref / keep_prob
    ok = jnp.isclose(y, 0.0, atol=1e-6) | jnp.isclose(y, scaled, rtol=1e-5, atol=1e-5)
    assert bool(jnp.all(ok)), "dropout output is not in {0, x/keep_prob}"

    print("KERNEL_OK")
</pallas_src>

<mosaic_0001>
module attributes {stable_mosaic.version = 11 : i64} {
  func.func @_pe_dropout_kernel(%arg0: i32, %arg1: memref<1xi32, #tpu.memory_space<smem>>, %arg2: memref<48x128xf32, #tpu.memory_space<vmem>>, %arg3: memref<48x128xf32, #tpu.memory_space<vmem>>, %arg4: memref<48x128xf32, #tpu.memory_space<vmem>>) attributes {dimension_semantics = [#tpu.dimension_semantics<parallel>], iteration_bounds = array<i64: 1>, scalar_prefetch = 1 : i64, scratch_operands = 0 : i64, tpu.core_type = #tpu.core_type<tc>, window_params = [{transform_indices = @transform_0, window_bounds = array<i64: 48, 128>}, {transform_indices = @transform_1, window_bounds = array<i64: 48, 128>}, {transform_indices = @transform_2, window_bounds = array<i64: 48, 128>}]} {
    %c0 = arith.constant 0 : index
    %c0_0 = arith.constant 0 : index
    %0 = vector.load %arg2[%c0, %c0_0] : memref<48x128xf32, #tpu.memory_space<vmem>>, vector<48x128xf32>
    %c0_1 = arith.constant 0 : index
    %c0_2 = arith.constant 0 : index
    %1 = vector.load %arg3[%c0_1, %c0_2] : memref<48x128xf32, #tpu.memory_space<vmem>>, vector<48x128xf32>
    %2 = arith.addf %0, %1 : vector<48x128xf32>
    %c0_3 = arith.constant 0 : index
    %c0_4 = arith.constant 0 : index
    %3 = vector.load %arg4[%c0_3, %c0_4] : memref<48x128xf32, #tpu.memory_space<vmem>>, vector<48x128xf32>
    tpu.vector_store %arg4[%c0_3, %c0_4], %2 {strides = array<i32>} : memref<48x128xf32, #tpu.memory_space<vmem>>, vector<48x128xf32>,
    return
  }
  func.func @transform_0(%arg0: i32, %arg1: memref<1xi32, #tpu.memory_space<smem>>) -> (i32, i32) {
    %c0_i32 = arith.constant 0 : i32
    %c0_i32_0 = arith.constant 0 : i32
    return %arg0, %c0_i32 : i32, i32
  }
  func.func @transform_1(%arg0: i32, %arg1: memref<1xi32, #tpu.memory_space<smem>>) -> (i32, i32) {
    %c0_i32 = arith.constant 0 : i32
    %c0_i32_0 = arith.constant 0 : i32
    return %arg0, %c0_i32 : i32, i32
  }
  func.func @transform_2(%arg0: i32, %arg1: memref<1xi32, #tpu.memory_space<smem>>) -> (i32, i32) {
    %c0_i32 = arith.constant 0 : i32
    %c0_i32_0 = arith.constant 0 : i32
    return %arg0, %c0_i32 : i32, i32
  }
}

</mosaic_0001>

<bundles_post_ra>
// kernel: tpu_custom_call.1
= control target key start
LH: loop header
LB: loop body
LE: loop exit
PB: predicated region body
PF: predicated region fallthrough
CT: control target
= control target key end

     0   :  { %9 = vsyncpa [#allocation5], 0  ;;  %s216_s0 = inlined_call_operand.<no memory space> [shape: s32[1], index: 0, kind: input, shape index: {}]   ;;  %s217_s1 = inlined_call_operand.hbm [shape: f32[48,128], index: 1, kind: input, shape index: {}]   ;;  %s218_s2 = inlined_call_operand.hbm [shape: f32[256,128], index: 2, kind: input, shape index: {}]   ;;  %s219_s3 = inlined_call_operand.hbm [shape: f32[48,128], index: 3, kind: output, shape index: {}]  }
   0x1   :  { %10 = vsyncpa [#allocation8], 0 }
   0x2   :  { %11 = vsyncpa [#allocation6], 0  ;;  %s16_s14 = sshll.u32 %s217_s1, 4  ;;  %s173_s15 = smov [#allocation4]   ;;  %s17_s14 = int_to_ptr.hbm [resolvable:$true] %s16_s14 }
   0x3   :  { %s18_s16 = sshll.u32 %s173_s15, 4  ;;  %s29_s18 = sshll.u32 %s218_s2, 4  ;;  %s19_s16 = int_to_ptr.vmem [resolvable:$true] %s18_s16  ;;  %s30_s18 = int_to_ptr.hbm [resolvable:$true] %s29_s18 }
   0x4   :  { %s174_s19 = smov 128   ;;  %s175_s20 = smov 8  }
   0x5   :  { %24 = dma.hbm_to_vmem [thread:$0]  %s17_s14, 768, %s19_s16, [#allocation5], %s174_s19, %s174_s19, %s175_s20  }
   0x6   :  { %s176_s21 = smov [#allocation7]  }
   0x7   :  { %s31_s22 = sshll.u32 %s176_s21, 4  ;;  %s32_s22 = int_to_ptr.vmem [resolvable:$true] %s31_s22 }
   0x8   :  { %37 = dma.hbm_to_vmem [thread:$0]  %s30_s18, 768, %s32_s22, [#allocation8], %s174_s19, %s174_s19, %s175_s20  }
   0x9   :  { %167 = dma.done.wait [#allocation5], 768  }
   0xa   :  { %168 = vsyncadd [#allocation5], 4294966528 }
   0xb   :  { %169 = dma.done.wait [#allocation8], 768  }
   0xc   :  { %170 = vsyncadd [#allocation8], 4294966528  ;;  %v46_v0 = vld [vmem:[#allocation4] sm:$0xff]  ;;  %v52_v1 = vld [vmem:[#allocation7] sm:$0xff]  ;;  %s177_s1 = smov [#allocation9]   ;;  %s76_s25 = sshll.u32 %s219_s3, 4  ;;  %s77_s25 = int_to_ptr.hbm [resolvable:$true] %s76_s25 }
   0xd   :  { %v47_v2 = vld [vmem:[#allocation4 + $0x8] sm:$0xff]  ;;  %v58_v3 = vadd.f32 %v52_v1, %v46_v0  ;;  %v53_v4 = vld [vmem:[#allocation7 + $0x8] sm:$0xff]  ;;  %v48_v5 = vld [vmem:[#allocation4 + $0x10] sm:$0xff]  ;;  %s74_s2 = sshll.u32 %s177_s1, 4  ;;  %s75_s2 = int_to_ptr.vmem [resolvable:$true] %s74_s2 }
   0xe   :  { %v54_v6 = vld [vmem:[#allocation7 + $0x10] sm:$0xff]  ;;  %v59_v7 = vadd.f32 %v53_v4, %v47_v2  ;;  %v49_v9 = vld [vmem:[#allocation4 + $0x18] sm:$0xff]  ;;  %v55_v10 = vld [vmem:[#allocation7 + $0x18] sm:$0xff] }
   0xf   :  { %v60_v8 = vadd.f32 %v54_v6, %v48_v5  ;;  %v50_v11 = vld [vmem:[#allocation4 + $0x20] sm:$0xff]  ;;  %64 = vst [vmem:[#allocation9] sm:$0xff] %v58_v3  ;;  %v61_v12 = vadd.f32 %v55_v10, %v49_v9  ;;  %v56_v13 = vld [vmem:[#allocation7 + $0x20] sm:$0xff]  ;;  %v51_v14 = vld [vmem:[#allocation4 + $0x28] sm:$0xff] }
  0x10   :  { %v57_v15 = vld [vmem:[#allocation7 + $0x28] sm:$0xff]  ;;  %65 = vst [vmem:[#allocation9 + $0x8] sm:$0xff] %v59_v7  ;;  %v62_v16 = vadd.f32 %v56_v13, %v50_v11 }
  0x11   :  { %v63_v17 = vadd.f32 %v57_v15, %v51_v14  ;;  %66 = vst [vmem:[#allocation9 + $0x10] sm:$0xff] %v60_v8 }
  0x12   :  { %67 = vst [vmem:[#allocation9 + $0x18] sm:$0xff] %v61_v12 }
  0x13   :  { %68 = vst [vmem:[#allocation9 + $0x20] sm:$0xff] %v62_v16 }
  0x14   :  { %69 = vst [vmem:[#allocation9 + $0x28] sm:$0xff] %v63_v17 }
  0x15   :  { %82 = dma.vmem_to_hbm [thread:$0]  %s75_s2, 768, %s77_s25, [#allocation6], %s174_s19, %s174_s19, %s175_s20  }
  0x16   :  { %171 = dma.done.wait [#allocation6], 768  }
  0x17   :  { %172 = vsyncadd [#allocation6], 4294966528 }
  0x18   :  { %87 = vsyncpa [#allocation5], 1 }
  0x19   :  { %88 = vsyncpa [#allocation8], 1 }
  0x1a   :  { %89 = vsyncpa [#allocation6], 1 }

</bundles_post_ra>
